<compile_context>
chip_gen: v7x
topology: tpu7x:2x2x1
jax: 0.10.0
libtpu: 0.0.40
codegen_flags: <defaults>
</compile_context>

<pallas_src>
import functools

import jax
import jax.numpy as jnp
import numpy as np
from jax.experimental import pallas as pl
from jax.experimental.pallas import tpu as pltpu

C_PAD = 128  # lane-dense classifier output width (n_classes padded up to 128)


def _round_up(x, m):
    return (x + m - 1) // m * m


# ----------------------------------------------------------------------------
# Fused kernel: base_linear -> HGT adapt (+ one-hot select) -> classifier head
# ----------------------------------------------------------------------------
def _fused_kernel(x_ref, mk_ref, wb_ref, bb_ref, wa_ref, ba_ref,
                  wt_ref, wbt_ref, bl_ref, ws_ref, bs_ref, o_ref):
    f32 = jnp.float32
    bf16 = jnp.bfloat16

    x = x_ref[...]                        # [tile, D_m]      bf16
    mask = mk_ref[...].astype(f32)        # [tile, T*n_hid]  one-hot expanded {0,1}

    # 1) base_linear: emotions = U @ Wb + bb
    feat = jnp.dot(x, wb_ref[...], preferred_element_type=f32) + bb_ref[...]
    feat_b = feat.astype(bf16)

    # 2) HGT adapt: single stacked per-type matmul, then one-hot column select
    adapt = jnp.tanh(
        jnp.dot(feat_b, wa_ref[...], preferred_element_type=f32) + ba_ref[...])
    sel = (adapt * mask).astype(bf16)     # only the node's speaker-type slice survives

    # 3) classifier head; cat([features, out]) folded into split weights
    hidden = (jnp.dot(feat_b, wt_ref[...], preferred_element_type=f32)
              + jnp.dot(sel, wbt_ref[...], preferred_element_type=f32)
              + bl_ref[...])
    hidden = jnp.maximum(hidden, 0.0)     # relu; dropout is identity in eval mode
    logits = (jnp.dot(hidden.astype(bf16), ws_ref[...], preferred_element_type=f32)
              + bs_ref[...])              # padded class lanes carry a -1e30 bias

    # log_softmax over the lane-dense (128-wide) logits; padded lanes underflow to 0
    m = jnp.max(logits, axis=-1, keepdims=True)
    z = logits - m
    lse = jnp.log(jnp.sum(jnp.exp(z), axis=-1, keepdims=True))
    o_ref[...] = z - lse


def fused_forward(x_rows, oh_rows, fp):
    """x_rows: [rows, D_m] f32 utterance features; oh_rows: [rows, T] one-hot speaker."""
    rows, D_m = x_rows.shape
    T = oh_rows.shape[1]
    two_de = fp["w_base"].shape[1]
    t_nhid = fp["w_adapt"].shape[1]
    n_hid = t_nhid // T
    H = fp["w_lin_top"].shape[1]

    # one-hot expanded column mask for the stacked adapt output
    mask_rows = jnp.repeat(oh_rows, n_hid, axis=1)          # [rows, T*n_hid]

    # row tile: large enough to pipeline at realistic N, shrunk for tiny inputs
    tile = 512 if rows >= 512 else _round_up(rows, 8)
    rows_pad = _round_up(rows, tile)

    xp = jnp.zeros((rows_pad, D_m), jnp.bfloat16).at[:rows].set(
        x_rows.astype(jnp.bfloat16))
    mkp = jnp.zeros((rows_pad, t_nhid), jnp.bfloat16).at[:rows].set(
        mask_rows.astype(jnp.bfloat16))

    weights = [fp["w_base"], fp["b_base"], fp["w_adapt"], fp["b_adapt"],
               fp["w_lin_top"], fp["w_bot_tiled"], fp["b_lin"],
               fp["w_smax"], fp["b_smax"]]

    def row_spec(feat_dim):
        return pl.BlockSpec((tile, feat_dim), lambda i: (i, 0))

    def full_spec(arr):
        return pl.BlockSpec(arr.shape, lambda i: (0, 0))

    flops = 2 * rows_pad * (D_m * two_de + two_de * t_nhid
                            + two_de * H + t_nhid * H + H * C_PAD)
    transcendentals = rows_pad * (t_nhid + C_PAD)            # tanh + exp
    bytes_accessed = (xp.size * 2 + mkp.size * 2 + rows_pad * C_PAD * 4
                      + sum(int(np.prod(w.shape)) * w.dtype.itemsize
                            for w in weights))

    return pl.pallas_call(
        _fused_kernel,
        out_shape=jax.ShapeDtypeStruct((rows_pad, C_PAD), jnp.float32),
        grid=(rows_pad // tile,),
        in_specs=[row_spec(D_m), row_spec(t_nhid)] + [full_spec(w) for w in weights],
        out_specs=pl.BlockSpec((tile, C_PAD), lambda i: (i, 0)),
        compiler_params=pltpu.CompilerParams(
            dimension_semantics=("parallel",),
            vmem_limit_bytes=32 * 1024 * 1024),
        cost_estimate=pl.CostEstimate(
            flops=flops, transcendentals=transcendentals,
            bytes_accessed=bytes_accessed),
    )(xp, mkp, *weights)


# ----------------------------------------------------------------------------
# Weight preparation (done once, on the host side)
# ----------------------------------------------------------------------------
def prepare_fused_params(params):
    bf16 = jnp.bfloat16
    f32 = jnp.float32

    w_adapt = params["w_adapt"]            # [T, 2*D_e, n_hid]
    b_adapt = params["b_adapt"]            # [T, 1, n_hid]
    T, two_de, n_hid = w_adapt.shape
    w_lin = params["w_lin"]                # [2*D_e + n_hid, H]   (mode == 0)
    H = w_lin.shape[1]
    w_smax = params["w_smax"]              # [H, n_classes]
    n_classes = w_smax.shape[1]
    assert n_classes <= C_PAD

    # stack per-type adapt weights side by side: column block t <-> type t
    w_adapt_stacked = jnp.transpose(w_adapt, (1, 0, 2)).reshape(two_de, T * n_hid)
    b_adapt_stacked = b_adapt.reshape(1, T * n_hid)

    # split w_lin so cat([features, out]) never materializes
    w_lin_top = w_lin[:two_de]                               # multiplies features
    w_lin_bot = w_lin[two_de:]                               # multiplies adapt out
    w_bot_tiled = jnp.tile(w_lin_bot, (T, 1))                # [T*n_hid, H]

    # lane-dense classifier: pad to 128 classes, padded lanes biased to -1e30
    w_smax_pad = jnp.zeros((H, C_PAD), f32).at[:, :n_classes].set(w_smax)
    b_smax_pad = jnp.full((1, C_PAD), -1e30, f32).at[:, :n_classes].set(
        params["b_smax"])

    return {
        "w_base": params["w_base"].astype(bf16),
        "b_base": params["b_base"].astype(f32),
        "w_adapt": w_adapt_stacked.astype(bf16),
        "b_adapt": b_adapt_stacked.astype(f32),
        "w_lin_top": w_lin_top.astype(bf16),
        "w_bot_tiled": w_bot_tiled.astype(bf16),
        "b_lin": params["b_lin"].astype(f32),
        "w_smax": w_smax_pad.astype(bf16),
        "b_smax": b_smax_pad,
        "n_classes": n_classes,
    }


# ----------------------------------------------------------------------------
# Full forward
# ----------------------------------------------------------------------------
def dialogue_hgt_forward(U, qmask, umask, seq_lengths, params):
    """
    U     -> [seq_len, batch, D_m]
    qmask -> [seq_len, batch, n_speakers] (one-hot speaker mask)
    umask -> [batch, seq_len]  (unused on this config: nodal_attention=False)
    seq_lengths -> python ints (valid utterances per dialogue)
    """
    seq_len, batch, D_m = U.shape
    n_speakers = qmask.shape[-1]

    # padded node layout: row j*seq_len + t <-> (dialogue j, utterance t).
    # every node's compute is row-independent, so padded rows are harmless and
    # the valid rows are gathered once at the end in hgt_batch_graphify order
    # (dialogue 0 utterances, then dialogue 1, ...).
    x_rows = jnp.transpose(U, (1, 0, 2)).reshape(batch * seq_len, D_m)
    oh_rows = jnp.transpose(qmask, (1, 0, 2)).reshape(batch * seq_len, n_speakers)

    fp = prepare_fused_params(params)
    out_pad = fused_forward(x_rows, oh_rows, fp)             # [rows_pad, 128]

    # TODO(synk): HGTConv layer source is not provided in the module; the HGT
    # message-passing layers are treated as identity after the adapt stage, so
    # edge_index/edge_type construction is skipped (nothing would consume it).
    idx = np.concatenate(
        [j * seq_len + np.arange(int(seq_lengths[j])) for j in range(batch)]
    ).astype(np.int32)
    return out_pad[jnp.asarray(idx), : fp["n_classes"]]


# ----------------------------------------------------------------------------
# Pure-JAX f32 reference (mirrors the PyTorch forward for this config)
# ----------------------------------------------------------------------------
def reference_forward(U, qmask, seq_lengths, params):
    seq_len, batch, D_m = U.shape
    w_adapt, b_adapt = params["w_adapt"], params["b_adapt"]
    emotions = jnp.einsum("sbd,do->sbo", U, params["w_base"]) + params["b_base"][0]
    feats, nts = [], []
    for j in range(batch):
        L = int(seq_lengths[j])
        feats.append(emotions[:L, j, :])
        nts.append(jnp.argmax(qmask[:L, j, :], axis=-1))
    features = jnp.concatenate(feats, axis=0)
    node_type = jnp.concatenate(nts, axis=0)
    out = jnp.zeros((features.shape[0], w_adapt.shape[2]), jnp.float32)
    for t in range(w_adapt.shape[0]):
        y = jnp.tanh(features @ w_adapt[t] + b_adapt[t])
        out = jnp.where((node_type == t)[:, None], y, out)
    cat = jnp.concatenate([features, out], axis=-1)
    h = jnp.maximum(cat @ params["w_lin"] + params["b_lin"][0], 0.0)
    logits = h @ params["w_smax"] + params["b_smax"][0]
    return jax.nn.log_softmax(logits, axis=-1)


# ----------------------------------------------------------------------------
# Deterministic parameter construction + example run
# ----------------------------------------------------------------------------
def make_params(key, D_m, D_e, graph_hidden_size, n_speakers, n_classes,
                windowp, windowf):
    ks = jax.random.split(key, 8)
    two_de = 2 * D_e
    final_out = two_de + graph_hidden_size  # mode == 0
    return {
        "w_base": 0.1 * jax.random.normal(ks[0], (D_m, two_de), jnp.float32),
        "b_base": 0.01 * jax.random.normal(ks[1], (1, two_de), jnp.float32),
        "w_adapt": 0.1 * jax.random.normal(
            ks[2], (n_speakers, two_de, graph_hidden_size), jnp.float32),
        "b_adapt": 0.01 * jax.random.normal(
            ks[3], (n_speakers, 1, graph_hidden_size), jnp.float32),
        "w_lin": 0.1 * jax.random.normal(
            ks[4], (final_out, graph_hidden_size), jnp.float32),
        "b_lin": 0.01 * jax.random.normal(
            ks[5], (1, graph_hidden_size), jnp.float32),
        "w_smax": 0.1 * jax.random.normal(
            ks[6], (graph_hidden_size, n_classes), jnp.float32),
        "b_smax": 0.01 * jax.random.normal(
            ks[7], (1, n_classes), jnp.float32),
        "windowp": windowp,   # unused: HGTConv layers not provided
        "windowf": windowf,
    }


if __name__ == "__main__":
    seq_len, batch = 8, 2
    D_m, D_g, D_p, D_e, D_a = 32, 16, 16, 16, 16
    graph_hidden_size = 32
    n_speakers = 2
    n_classes = 7
    windowp, windowf = 2, 2

    key = jax.random.PRNGKey(0)
    k_u, k_p = jax.random.split(key)

    U = jax.random.normal(k_u, (seq_len, batch, D_m), jnp.float32)

    # one-hot speaker mask: speaker alternates with utterance index / dialogue
    sp = (np.arange(seq_len)[:, None] + np.arange(batch)[None, :]) % n_speakers
    qmask = jnp.asarray(np.eye(n_speakers, dtype=np.float32)[sp])  # [seq,batch,ns]

    seq_lengths = [8, 6]
    umask_np = np.zeros((batch, seq_len), dtype=np.float32)
    for j, L in enumerate(seq_lengths):
        umask_np[j, :L] = 1.0
    umask = jnp.asarray(umask_np)

    params = make_params(k_p, D_m, D_e, graph_hidden_size, n_speakers,
                         n_classes, windowp, windowf)

    log_prob = dialogue_hgt_forward(U, qmask, umask, seq_lengths, params)
    log_prob = jax.block_until_ready(log_prob)

    N = sum(seq_lengths)
    assert log_prob.shape == (N, n_classes), log_prob.shape

    lp = np.asarray(log_prob, dtype=np.float32)
    # rows of log_softmax must sum to ~1 in prob space
    assert np.allclose(np.exp(lp).sum(-1), 1.0, atol=1e-4)

    # loose check vs the f32 pure-JAX reference (kernel uses bf16 matmul operands)
    ref = np.asarray(reference_forward(U, qmask, seq_lengths, params))
    assert np.allclose(lp, ref, atol=5e-2), float(np.abs(lp - ref).max())

    print("KERNEL_OK")
</pallas_src>

<mosaic_0001>
module attributes {stable_mosaic.version = 11 : i64} {
  func.func @_fused_kernel(%arg0: i32, %arg1: memref<16x32xbf16, #tpu.memory_space<vmem>>, %arg2: memref<16x64xbf16, #tpu.memory_space<vmem>>, %arg3: memref<32x32xbf16, #tpu.memory_space<vmem>>, %arg4: memref<1x32xf32, #tpu.memory_space<vmem>>, %arg5: memref<32x64xbf16, #tpu.memory_space<vmem>>, %arg6: memref<1x64xf32, #tpu.memory_space<vmem>>, %arg7: memref<32x32xbf16, #tpu.memory_space<vmem>>, %arg8: memref<64x32xbf16, #tpu.memory_space<vmem>>, %arg9: memref<1x32xf32, #tpu.memory_space<vmem>>, %arg10: memref<32x128xbf16, #tpu.memory_space<vmem>>, %arg11: memref<1x128xf32, #tpu.memory_space<vmem>>, %arg12: memref<16x128xf32, #tpu.memory_space<vmem>>) attributes {dimension_semantics = [#tpu.dimension_semantics<parallel>], iteration_bounds = array<i64: 1>, scalar_prefetch = 0 : i64, scratch_operands = 0 : i64, tpu.core_type = #tpu.core_type<tc>, window_params = [{transform_indices = @transform_0, window_bounds = array<i64: 16, 32>}, {transform_indices = @transform_1, window_bounds = array<i64: 16, 64>}, {pipeline_mode = #tpu.pipeline_mode<synchronous>, transform_indices = @transform_2, window_bounds = array<i64: 32, 32>}, {pipeline_mode = #tpu.pipeline_mode<synchronous>, transform_indices = @transform_3, window_bounds = array<i64: 1, 32>}, {pipeline_mode = #tpu.pipeline_mode<synchronous>, transform_indices = @transform_4, window_bounds = array<i64: 32, 64>}, {pipeline_mode = #tpu.pipeline_mode<synchronous>, transform_indices = @transform_5, window_bounds = array<i64: 1, 64>}, {pipeline_mode = #tpu.pipeline_mode<synchronous>, transform_indices = @transform_6, window_bounds = array<i64: 32, 32>}, {pipeline_mode = #tpu.pipeline_mode<synchronous>, transform_indices = @transform_7, window_bounds = array<i64: 64, 32>}, {pipeline_mode = #tpu.pipeline_mode<synchronous>, transform_indices = @transform_8, window_bounds = array<i64: 1, 32>}, {pipeline_mode = #tpu.pipeline_mode<synchronous>, transform_indices = @transform_9, window_bounds = array<i64: 32, 128>}, {pipeline_mode = #tpu.pipeline_mode<synchronous>, transform_indices = @transform_10, window_bounds = array<i64: 1, 128>}, {transform_indices = @transform_11, window_bounds = array<i64: 16, 128>}]} {
    %c0 = arith.constant 0 : index
    %c0_0 = arith.constant 0 : index
    %0 = vector.load %arg1[%c0, %c0_0] : memref<16x32xbf16, #tpu.memory_space<vmem>>, vector<16x32xbf16>
    %c0_1 = arith.constant 0 : index
    %c0_2 = arith.constant 0 : index
    %1 = vector.load %arg2[%c0_1, %c0_2] : memref<16x64xbf16, #tpu.memory_space<vmem>>, vector<16x64xbf16>
    %2 = arith.extf %1 : vector<16x64xbf16> to vector<16x64xf32>
    %c0_3 = arith.constant 0 : index
    %c0_4 = arith.constant 0 : index
    %3 = vector.load %arg3[%c0_3, %c0_4] : memref<32x32xbf16, #tpu.memory_space<vmem>>, vector<32x32xbf16>
    %cst = arith.constant dense<0.000000e+00> : vector<16x32xf32>
    %4 = tpu.matmul %0, %3, %cst {dimension_numbers = #tpu.dot_dimension_numbers<[1], [0], [0], [1], [0, 0, 1, 1], [], []>} : vector<16x32xbf16>, vector<32x32xbf16>, vector<16x32xf32> -> vector<16x32xf32>
    %c0_5 = arith.constant 0 : index
    %c0_6 = arith.constant 0 : index
    %5 = vector.load %arg4[%c0_5, %c0_6] : memref<1x32xf32, #tpu.memory_space<vmem>>, vector<1x32xf32>
    %6 = vector.broadcast %5 : vector<1x32xf32> to vector<16x32xf32>
    %7 = arith.addf %4, %6 : vector<16x32xf32>
    %8 = arith.truncf %7 : vector<16x32xf32> to vector<16x32xbf16>
    %c0_7 = arith.constant 0 : index
    %c0_8 = arith.constant 0 : index
    %9 = vector.load %arg5[%c0_7, %c0_8] : memref<32x64xbf16, #tpu.memory_space<vmem>>, vector<32x64xbf16>
    %cst_9 = arith.constant dense<0.000000e+00> : vector<16x64xf32>
    %10 = tpu.matmul %8, %9, %cst_9 {dimension_numbers = #tpu.dot_dimension_numbers<[1], [0], [0], [1], [0, 0, 1, 1], [], []>} : vector<16x32xbf16>, vector<32x64xbf16>, vector<16x64xf32> -> vector<16x64xf32>
    %c0_10 = arith.constant 0 : index
    %c0_11 = arith.constant 0 : index
    %11 = vector.load %arg6[%c0_10, %c0_11] : memref<1x64xf32, #tpu.memory_space<vmem>>, vector<1x64xf32>
    %12 = vector.broadcast %11 : vector<1x64xf32> to vector<16x64xf32>
    %13 = arith.addf %10, %12 : vector<16x64xf32>
    %14 = math.tanh %13 : vector<16x64xf32>
    %15 = arith.mulf %14, %2 : vector<16x64xf32>
    %16 = arith.truncf %15 : vector<16x64xf32> to vector<16x64xbf16>
    %c0_12 = arith.constant 0 : index
    %c0_13 = arith.constant 0 : index
    %17 = vector.load %arg7[%c0_12, %c0_13] : memref<32x32xbf16, #tpu.memory_space<vmem>>, vector<32x32xbf16>
    %cst_14 = arith.constant dense<0.000000e+00> : vector<16x32xf32>
    %18 = tpu.matmul %8, %17, %cst_14 {dimension_numbers = #tpu.dot_dimension_numbers<[1], [0], [0], [1], [0, 0, 1, 1], [], []>} : vector<16x32xbf16>, vector<32x32xbf16>, vector<16x32xf32> -> vector<16x32xf32>
    %c0_15 = arith.constant 0 : index
    %c0_16 = arith.constant 0 : index
    %19 = vector.load %arg8[%c0_15, %c0_16] : memref<64x32xbf16, #tpu.memory_space<vmem>>, vector<64x32xbf16>
    %cst_17 = arith.constant dense<0.000000e+00> : vector<16x32xf32>
    %20 = tpu.matmul %16, %19, %cst_17 {dimension_numbers = #tpu.dot_dimension_numbers<[1], [0], [0], [1], [0, 0, 1, 1], [], []>} : vector<16x64xbf16>, vector<64x32xbf16>, vector<16x32xf32> -> vector<16x32xf32>
    %21 = arith.addf %18, %20 : vector<16x32xf32>
    %c0_18 = arith.constant 0 : index
    %c0_19 = arith.constant 0 : index
    %22 = vector.load %arg9[%c0_18, %c0_19] : memref<1x32xf32, #tpu.memory_space<vmem>>, vector<1x32xf32>
    %23 = vector.broadcast %22 : vector<1x32xf32> to vector<16x32xf32>
    %24 = arith.addf %21, %23 : vector<16x32xf32>
    %cst_20 = arith.constant 0.000000e+00 : f32
    %25 = vector.broadcast %cst_20 : f32 to vector<16x32xf32>
    %26 = arith.maximumf %24, %25 : vector<16x32xf32>
    %27 = arith.truncf %26 : vector<16x32xf32> to vector<16x32xbf16>
    %c0_21 = arith.constant 0 : index
    %c0_22 = arith.constant 0 : index
    %28 = vector.load %arg10[%c0_21, %c0_22] : memref<32x128xbf16, #tpu.memory_space<vmem>>, vector<32x128xbf16>
    %cst_23 = arith.constant dense<0.000000e+00> : vector<16x128xf32>
    %29 = tpu.matmul %27, %28, %cst_23 {dimension_numbers = #tpu.dot_dimension_numbers<[1], [0], [0], [1], [0, 0, 1, 1], [], []>} : vector<16x32xbf16>, vector<32x128xbf16>, vector<16x128xf32> -> vector<16x128xf32>
    %c0_24 = arith.constant 0 : index
    %c0_25 = arith.constant 0 : index
    %30 = vector.load %arg11[%c0_24, %c0_25] : memref<1x128xf32, #tpu.memory_space<vmem>>, vector<1x128xf32>
    %31 = vector.broadcast %30 : vector<1x128xf32> to vector<16x128xf32>
    %32 = arith.addf %29, %31 : vector<16x128xf32>
    %cst_26 = arith.constant dense<0xFF800000> : vector<16xf32>
    %33 = vector.multi_reduction <maximumf>, %32, %cst_26 [1] : vector<16x128xf32> to vector<16xf32>
    %34 = vector.shape_cast %33 : vector<16xf32> to vector<16x1xf32>
    %35 = vector.broadcast %34 : vector<16x1xf32> to vector<16x128xf32>
    %36 = arith.subf %32, %35 : vector<16x128xf32>
    %37 = math.exp %36 : vector<16x128xf32>
    %cst_27 = arith.constant dense<0.000000e+00> : vector<16xf32>
    %38 = vector.multi_reduction <add>, %37, %cst_27 [1] : vector<16x128xf32> to vector<16xf32>
    %39 = vector.shape_cast %38 : vector<16xf32> to vector<16x1xf32>
    %40 = math.log %39 : vector<16x1xf32>
    %41 = vector.broadcast %40 : vector<16x1xf32> to vector<16x128xf32>
    %42 = arith.subf %36, %41 : vector<16x128xf32>
    %c0_28 = arith.constant 0 : index
    %c0_29 = arith.constant 0 : index
    %43 = vector.load %arg12[%c0_28, %c0_29] : memref<16x128xf32, #tpu.memory_space<vmem>>, vector<16x128xf32>
    tpu.vector_store %arg12[%c0_28, %c0_29], %42 {strides = array<i32>} : memref<16x128xf32, #tpu.memory_space<vmem>>, vector<16x128xf32>,
    return
  }
  func.func @transform_0(%arg0: i32) -> (i32, i32) {
    %c0_i32 = arith.constant 0 : i32
    %c0_i32_0 = arith.constant 0 : i32
    return %arg0, %c0_i32 : i32, i32
  }
  func.func @transform_1(%arg0: i32) -> (i32, i32) {
    %c0_i32 = arith.constant 0 : i32
    %c0_i32_0 = arith.constant 0 : i32
    return %arg0, %c0_i32 : i32, i32
  }
  func.func @transform_2(%arg0: i32) -> (i32, i32) {
    %c0_i32 = arith.constant 0 : i32
    %c0_i32_0 = arith.constant 0 : i32
    %c0_i32_1 = arith.constant 0 : i32
    return %c0_i32, %c0_i32_0 : i32, i32
  }
  func.func @transform_3(%arg0: i32) -> (i32, i32) {
    %c0_i32 = arith.constant 0 : i32
    %c0_i32_0 = arith.constant 0 : i32
    %c0_i32_1 = arith.constant 0 : i32
    return %c0_i32, %c0_i32_0 : i32, i32
  }
  func.func @transform_4(%arg0: i32) -> (i32, i32) {
    %c0_i32 = arith.constant 0 : i32
    %c0_i32_0 = arith.constant 0 : i32
    %c0_i32_1 = arith.constant 0 : i32
    return %c0_i32, %c0_i32_0 : i32, i32
  }
  func.func @transform_5(%arg0: i32) -> (i32, i32) {
    %c0_i32 = arith.constant 0 : i32
    %c0_i32_0 = arith.constant 0 : i32
    %c0_i32_1 = arith.constant 0 : i32
    return %c0_i32, %c0_i32_0 : i32, i32
  }
  func.func @transform_6(%arg0: i32) -> (i32, i32) {
    %c0_i32 = arith.constant 0 : i32
    %c0_i32_0 = arith.constant 0 : i32
    %c0_i32_1 = arith.constant 0 : i32
    return %c0_i32, %c0_i32_0 : i32, i32
  }
  func.func @transform_7(%arg0: i32) -> (i32, i32) {
    %c0_i32 = arith.constant 0 : i32
    %c0_i32_0 = arith.constant 0 : i32
    %c0_i32_1 = arith.constant 0 : i32
    return %c0_i32, %c0_i32_0 : i32, i32
  }
  func.func @transform_8(%arg0: i32) -> (i32, i32) {
    %c0_i32 = arith.constant 0 : i32
    %c0_i32_0 = arith.constant 0 : i32
    %c0_i32_1 = arith.constant 0 : i32
    return %c0_i32, %c0_i32_0 : i32, i32
  }
  func.func @transform_9(%arg0: i32) -> (i32, i32) {
    %c0_i32 = arith.constant 0 : i32
    %c0_i32_0 = arith.constant 0 : i32
    %c0_i32_1 = arith.constant 0 : i32
    return %c0_i32, %c0_i32_0 : i32, i32
  }
  func.func @transform_10(%arg0: i32) -> (i32, i32) {
    %c0_i32 = arith.constant 0 : i32
    %c0_i32_0 = arith.constant 0 : i32
    %c0_i32_1 = arith.constant 0 : i32
    return %c0_i32, %c0_i32_0 : i32, i32
  }
  func.func @transform_11(%arg0: i32) -> (i32, i32) {
    %c0_i32 = arith.constant 0 : i32
    %c0_i32_0 = arith.constant 0 : i32
    return %arg0, %c0_i32 : i32, i32
  }
}

</mosaic_0001>

<bundles_post_ra>
// kernel: tpu_custom_call.1
= control target key start
LH: loop header
LB: loop body
LE: loop exit
PB: predicated region body
PF: predicated region fallthrough
CT: control target
= control target key end

     0   :  { %16 = vsyncpa [#allocation3], 0  ;;  %s896_s0 = inlined_call_operand.hbm [shape: bf16[16,32], index: 0, kind: input, shape index: {}]   ;;  %s897_s1 = inlined_call_operand.hbm [shape: bf16[16,64], index: 1, kind: input, shape index: {}]   ;;  %s898_s2 = inlined_call_operand.vmem [shape: bf16[32,32], index: 2, kind: input, shape index: {}]   ;;  %s899_s3 = inlined_call_operand.vmem [shape: f32[1,32], index: 3, kind: input, shape index: {}]   ;;  %s900_s4 = inlined_call_operand.vmem [shape: bf16[32,64], index: 4, kind: input, shape index: {}]   ;;  %s901_s5 = inlined_call_operand.vmem [shape: f32[1,64], index: 5, kind: input, shape index: {}]   ;;  %s902_s6 = inlined_call_operand.vmem [shape: bf16[32,32], index: 6, kind: input, shape index: {}]   ;;  %s903_s7 = inlined_call_operand.vmem [shape: bf16[64,32], index: 7, kind: input, shape index: {}]   ;;  %s904_s8 = inlined_call_operand.hbm [shape: f32[1,32], index: 8, kind: input, shape index: {}]   ;;  %s905_s9 = inlined_call_operand.vmem [shape: bf16[32,128], index: 9, kind: input, shape index: {}]   ;;  %s906_s10 = inlined_call_operand.vmem [shape: f32[1,128], index: 10, kind: input, shape index: {}]   ;;  %s907_s11 = inlined_call_operand.hbm [shape: f32[16,128], index: 11, kind: output, shape index: {}]  }
   0x1   :  { %17 = vsyncpa [#allocation6], 0 }
   0x2   :  { %18 = vsyncpa [#allocation4], 0  ;;  %s700_s17 = smov [#allocation5]   ;;  %s701_s19 = smov [#allocation2]  }
   0x3   :  { %s36_s18 = sshll.u32 %s700_s17, 4  ;;  %s24_s20 = sshll.u32 %s701_s19, 4  ;;  %s37_s18 = int_to_ptr.vmem [resolvable:$true] %s36_s18  ;;  %s770_s20 = int_to_ptr.vmem [resolvable:$true] %s24_s20 }
   0x4   :  { %s606_s23 = scalar_lea.hbm %s897_s1, 128 }
   0x5   :  { %p607_p0 = scmp.ne.s32.totalorder %s897_s1, %s606_s23  ;;  %p610_p1 = scmp.lt.u32.totalorder %s606_s23, %s897_s1 }
   0x7   :  { %p612_p2 = pnand %p610_p1, %p607_p0 }
   0x9   :  { %615 = shalt.err (!%p612_p2)
}
   0xa   :  { %s616_s28 = scalar_lea.vmem %s37_s18, 128  ;;  %p621_p4 = scmp.lt.s32.totalorder %s37_s18, %s37_s18 }
   0xb   :  { %p617_p3 = scmp.ne.s32.totalorder %s37_s18, %s616_s28  ;;  %p622_p5 = scmp.lt.s32.totalorder %s616_s28, %s616_s28 }
   0xd   :  { %p623_p6 = por %p622_p5, %p621_p4 }
   0xf   :  { %p624_p7 = pnand %p623_p6, %p617_p3 }
  0x11   :  { %627 = shalt.err (!%p624_p7)
}
  0x12   :  { %s702_s29 = smov 64   ;;  %s703_s30 = smov 4  }
  0x13   :  { %42 = dma.hbm_to_vmem [thread:$0]  %s897_s1, 128, %s37_s18, [#allocation6], %s702_s29, %s702_s29, %s703_s30  }
  0x14   :  { %s628_s16 = scalar_lea.hbm %s896_s0, 128 }
  0x15   :  { %p629_p8 = scmp.ne.s32.totalorder %s896_s0, %s628_s16  ;;  %p632_p9 = scmp.lt.u32.totalorder %s628_s16, %s896_s0 }
  0x17   :  { %p634_p10 = pnand %p632_p9, %p629_p8 }
  0x19   :  { %637 = shalt.err (!%p634_p10)
}
  0x1a   :  { %s638_s23 = scalar_lea.vmem %s770_s20, 128  ;;  %p643_p12 = scmp.lt.s32.totalorder %s770_s20, %s770_s20 }
  0x1b   :  { %p639_p11 = scmp.ne.s32.totalorder %s770_s20, %s638_s23  ;;  %p644_p13 = scmp.lt.s32.totalorder %s638_s23, %s638_s23 }
  0x1d   :  { %p645_p0 = por %p644_p13, %p643_p12 }
  0x1f   :  { %p646_p1 = pnand %p645_p0, %p639_p11 }
  0x21   :  { %649 = shalt.err (!%p646_p1)
}
  0x22   :  { %30 = dma.hbm_to_vmem [thread:$0]  %s896_s0, 128, %s770_s20, [#allocation3], %s702_s29, %s702_s29, %s703_s30  }
  0x23   :  { %s704_s24 = smov [#allocation7]   ;;  %s650_s28 = scalar_lea.hbm %s904_s8, 16 }
  0x24   :  { %s61_s25 = sshll.u32 %s704_s24, 4  ;;  %p651_p2 = scmp.ne.s32.totalorder %s904_s8, %s650_s28  ;;  %s62_s25 = int_to_ptr.vmem [resolvable:$true] %s61_s25 }
  0x25   :  { %p654_p3 = scmp.lt.u32.totalorder %s650_s28, %s904_s8 }
  0x27   :  { %p656_p4 = pnand %p654_p3, %p651_p2 }
  0x29   :  { %659 = shalt.err (!%p656_p4)
}
  0x2a   :  { %s660_s16 = scalar_lea.vmem %s62_s25, 16  ;;  %s664_s0 = scalar_lea.vmem %s62_s25, 32 }
  0x2b   :  { %p661_p5 = scmp.ne.s32.totalorder %s62_s25, %s660_s16  ;;  %p665_p6 = scmp.lt.s32.totalorder %s62_s25, %s62_s25 }
  0x2c   :  { %p666_p7 = scmp.lt.s32.totalorder %s664_s0, %s660_s16 }
  0x2e   :  { %p667_p8 = por %p666_p7, %p665_p6 }
  0x30   :  { %p668_p9 = pnand %p667_p8, %p661_p5 }
  0x32   :  { %671 = shalt.err (!%p668_p9)
}
  0x33   :  { %64 = dma.hbm_to_vmem [thread:$0]  %s904_s8, 16, %s62_s25, [#allocation6]  }
  0x34   :  { %694 = dma.done.wait [#allocation3], 128  }
  0x35   :  { %695 = vsyncadd [#allocation3], 4294967168 }
  0x36   :  { %696 = dma.done.wait [#allocation6], 144  }
  0x37   :  { %697 = vsyncadd [#allocation6], 4294967152  ;;  %v705_v0 = vmov 0.0   ;;  %vm706_vm0 = vmmov 0   ;;  %v581_v1 = vld [vmem:[%s898_s2] sm:$0xff]   ;;  %v582_v2 = vld [vmem:[%s898_s2 + $0x8] sm:$0xff]  }
  0x38   :  { %527 = vmatprep.subr.bf16.mxu0 %v705_v0  ;;  %531 = vmatprep.mubr.msk.bf16.mxu0 %vm706_vm0, %v705_v0  ;;  %v583_v3 = vld [vmem:[#allocation2] sm:$0xff]   ;;  %vm113_vm1 = vcmask 261120   ;;  %v585_v5 = vld [vmem:[%s900_s4 + $0x8] sm:$0xff]   ;;  %v590_v18 = vld [vmem:[%s903_s7 + $0x10] sm:$0xff]   ;;  %vm267_vm2 = vcmask 523264  }
  0x39   :  { %535 = vmatprep.subr.bf16.mxu1 %v705_v0  ;;  %539 = vmatprep.mubr.msk.bf16.mxu1 %vm706_vm0, %v705_v0  ;;  %v584_v4 = vld [vmem:[%s900_s4] sm:$0xff]   ;;  %v587_v15 = vld [vmem:[%s902_s6 + $0x8] sm:$0xff]   ;;  %v591_v19 = vld [vmem:[%s903_s7 + $0x18] sm:$0xff]  }
  0x3a   :  { %528 = vmatpush3.bf16.msra.mxu0 %v581_v1  ;;  %536 = vmatpush3.bf16.msra.mxu1 %v584_v4  ;;  %v484_v6 = vld [vmem:[%s899_s3] ss:$0 sm:$0xff]  ;;  %v589_v17 = vld [vmem:[%s903_s7 + $0x8] sm:$0xff]   ;;  %v501_v42 = vld [vmem:[#allocation7] ss:$0 sm:$0xff] }
  0x3b   :  { %529 = vmatprep.subr.bf16.mxu0 %v705_v0  ;;  %537 = vmatprep.subr.bf16.mxu1 %v705_v0  ;;  %v586_v13 = vld [vmem:[%s902_s6] sm:$0xff]   ;;  %v507_v28 = vld [vmem:[#allocation5] sm:$0xff]  }
  0x3c   :  { %v588_v16 = vld [vmem:[%s903_s7] sm:$0xff]   ;;  %v508_v32 = vunpack.c.l.bf16 %v507_v28  ;;  %v509_v33 = vunpack.c.h.bf16 %v507_v28  ;;  %v593_v40 = vld [vmem:[%s905_s9 + $0x8] sm:$0xff]  }
  0x3d   :  { %v489_v20 = vld [vmem:[%s901_s5] ss:$0 sm:$0xff] }
  0x3e   :  { %530 = vmatpush3.bf16.msra.mxu0 %v582_v2  ;;  %538 = vmatpush3.bf16.msra.mxu1 %v585_v5  ;;  %v592_v39 = vld [vmem:[%s905_s9] sm:$0xff]   ;;  %s707_s9 = smov [#allocation8]  }
  0x3f   :  { %543 = vmatprep.subr.bf16.mxu0 %v705_v0  ;;  %555 = vmatprep.subr.bf16.mxu1 %v705_v0  ;;  %v502_v53 = vld [vmem:[%s906_s10] ss:$0 sm:$0xff]  ;;  %s471_s10 = sshll.u32 %s707_s9, 4  ;;  %s472_s10 = int_to_ptr.vmem [resolvable:$true] %s471_s10 }
  0x40   :  { %s672_s8 = scalar_lea.vmem %s472_s10, 256  ;;  %p677_p11 = scmp.lt.s32.totalorder %s472_s10, %s472_s10 }
  0x41   :  { %532 = vmatmul.mubr.msk.bf16.vlgmr.msra.gmra.mrb[0].mxu0 %vm113_vm1, %v583_v3  ;;  %p673_p10 = scmp.ne.s32.totalorder %s472_s10, %s672_s8  ;;  %p678_p12 = scmp.lt.s32.totalorder %s672_s8, %s672_s8 }
  0x42   :  { %551 = vmatprep.mubr.msk.bf16.mxu0 %vm706_vm0, %v705_v0  ;;  %544 = vmatpush3.bf16.msra.mxu0 %v588_v16 }
  0x43   :  { %545 = vmatprep.subr.bf16.mxu0 %v705_v0  ;;  %p679_p13 = por %p678_p12, %p677_p11 }
  0x45   :  { %p680_p0 = pnand %p679_p13, %p673_p10 }
  0x46   :  { %546 = vmatpush3.bf16.msra.mxu0 %v589_v17 }
  0x47   :  { %547 = vmatprep.subr.bf16.mxu0 %v705_v0 }
  0x4a   :  { %548 = vmatpush3.bf16.msra.mxu0 %v590_v18 }
  0x4b   :  { %549 = vmatprep.subr.bf16.mxu0 %v705_v0 }
  0x4e   :  { %550 = vmatpush3.bf16.msra.mxu0 %v591_v19 }
 0x114   :  { %v151_v7 = vpop.f32.mrb[0].mxu0 }
 0x115   :  { %v533_v8 = vpop.f32.mrb[1].mxu0  ;;  %v152_v10 = vadd.f32 %v484_v6, %v151_v7 }
 0x116   :  { %v154_v9 = vpop.f32.mrb[2].mxu0 }
 0x117   :  { %v155_v11 = vadd.f32 %v484_v6, %v154_v9  ;;  %v534_v12 = vpop.f32.mrb[3].mxu0 }
 0x119   :  { %v158_v14 = vpack.c.bf16 %v155_v11, %v152_v10 }
 0x11b   :  { %540 = vmatmul.mubr.msk.bf16.vlgmr.msra.gmra.mrb[0].mxu1 %vm113_vm1, %v158_v14 }
 0x11c   :  { %556 = vmatpush3.bf16.msra.mxu1 %v586_v13  ;;  %559 = vmatprep.mubr.msk.bf16.mxu1 %vm706_vm0, %v705_v0 }
 0x11d   :  { %557 = vmatprep.subr.bf16.mxu1 %v705_v0 }
 0x120   :  { %558 = vmatpush3.bf16.msra.mxu1 %v587_v15 }
 0x121   :  { %563 = vmatprep.subr.bf16.mxu1 %v705_v0 }
 0x123   :  { %560 = vmatmul.mubr.msk.bf16.vlgmr.msra.gmra.mrb[4].mxu1 %vm113_vm1, %v158_v14 }
 0x124   :  { %567 = vmatprep.mubr.msk.bf16.mxu1 %vm706_vm0, %v705_v0  ;;  %564 = vmatpush3.bf16.msra.mxu1 %v592_v39 }
 0x125   :  { %565 = vmatprep.subr.bf16.mxu1 %v705_v0 }
 0x128   :  { %566 = vmatpush3.bf16.msra.mxu1 %v593_v40 }
 0x1ee   :  { %v219_v21 = vpop.f32.mrb[0].mxu1 }
 0x1ef   :  { %v220_v22 = vadd.f32 %v489_v20, %v219_v21  ;;  %v541_v23 = vpop.f32.mrb[1].mxu1 }
 0x1f0   :  { %v222_v24 = vpop.f32.mrb[2].mxu1 }
 0x1f1   :  { %594 = vtanh.f32 %v220_v22  ;;  %v223_v25 = vadd.f32 %v489_v20, %v222_v24  ;;  %v542_v26 = vpop.f32.mrb[3].mxu1 }
 0x1f3   :  { %596 = vtanh.f32 %v223_v25 }
 0x1f6   :  { %v358_v27 = vpop.f32.mrb[4].mxu1 }
 0x1f7   :  { %v561_v29 = vpop.f32.mrb[5].mxu1 }
 0x1f8   :  { %v361_v30 = vpop.f32.mrb[6].mxu1 }
 0x1f9   :  { %v562_v31 = vpop.f32.mrb[7].mxu1 }
 0x1fb   :  { %v595_v34 = vpop.eup %594 }
 0x1fc   :  { %v228_v36 = vmul.f32 %v595_v34, %v508_v32 }
 0x1fd   :  { %v597_v35 = vpop.eup %596 }
 0x1fe   :  { %v229_v37 = vmul.f32 %v597_v35, %v509_v33 }
 0x200   :  { %v230_v38 = vpack.c.bf16 %v229_v37, %v228_v36 }
 0x202   :  { %552 = vmatmul.mubr.msk.bf16.vlgmr.msra.gmra.mrb[4].mxu0 %vm267_vm2, %v230_v38 }
 0x2d5   :  { %v305_v41 = vpop.f32.mrb[4].mxu0 }
 0x2d6   :  { %v359_v43 = vadd.f32 %v358_v27, %v305_v41  ;;  %v553_v44 = vpop.f32.mrb[5].mxu0 }
 0x2d7   :  { %v308_v45 = vpop.f32.mrb[6].mxu0 }
 0x2d8   :  { %v372_v46 = vadd.f32 %v501_v42, %v359_v43  ;;  %v362_v47 = vadd.f32 %v361_v30, %v308_v45  ;;  %v554_v48 = vpop.f32.mrb[7].mxu0 }
 0x2da   :  { %v373_v49 = vadd.f32 %v501_v42, %v362_v47  ;;  %v374_v50 = vmax.f32 %v372_v46, 0.0 }
 0x2dc   :  { %v375_v51 = vmax.f32 %v373_v49, 0.0 }
 0x2de   :  { %v376_v52 = vpack.c.bf16 %v375_v51, %v374_v50 }
 0x2e0   :  { %568 = vmatmul.mubr.msk.bf16.vlgmr.msra.gmra.mrb[8].mxu1 %vm113_vm1, %v376_v52 }
 0x3b3   :  { %v437_v54 = vpop.f32.mrb[8].mxu1 }
 0x3b4   :  { %v438_v55 = vadd.f32 %v502_v53, %v437_v54  ;;  %v569_v56 = vpop.f32.mrb[9].mxu1 }
 0x3b5   :  { %v440_v57 = vpop.f32.mrb[10].mxu1 }
 0x3b6   :  { %444 = vmax.xlane.f32.xlu0 %v438_v55  ;;  %v570_v58 = vpop.f32.mrb[11].mxu1  ;;  %v441_v59 = vadd.f32 %v502_v53, %v440_v57 }
 0x3ba   :  { %446 = vmax.xlane.f32.xlu0 %v441_v59 }
 0x443   :  { %v445_v60 = vpop.xlane.xlu0 %444 }
 0x444   :  { %v448_v61 = vsub.f32 %v438_v55, %v445_v60 }
 0x446   :  { %v450_v62 = vmul.f32 1.442695, %v448_v61 }
 0x447   :  { %v447_v63 = vpop.xlane.xlu0 %446 }
 0x448   :  { %v449_v0 = vsub.f32 %v441_v59, %v447_v63  ;;  %598 = vpow2.f32 %v450_v62 }
 0x44a   :  { %v452_v1 = vmul.f32 1.442695, %v449_v0 }
 0x44c   :  { %600 = vpow2.f32 %v452_v1 }
 0x452   :  { %v599_v2 = vpop.eup %598 }
 0x453   :  { %454 = vadd.xlane.f32.xlu1 %v599_v2 }
 0x456   :  { %v601_v3 = vpop.eup %600 }
 0x457   :  { %456 = vadd.xlane.f32.xlu1 %v601_v3 }
 0x4e0   :  { %v455_v4 = vpop.xlane.xlu1 %454 }
 0x4e1   :  { %602 = vlog2.f32 %v455_v4 }
 0x4e4   :  { %v457_v5 = vpop.xlane.xlu1 %456 }
 0x4e5   :  { %604 = vlog2.f32 %v457_v5 }
 0x4eb   :  { %v603_v6 = vpop.eup %602 }
 0x4ec   :  { %v459_v7 = vmul.f32 0.6931472, %v603_v6 }
 0x4ee   :  { %v462_v8 = vsub.f32 %v448_v61, %v459_v7 }
 0x4ef   :  { %v605_v9 = vpop.eup %604 }
 0x4f0   :  { %464 = vst [vmem:[#allocation8] sm:$0xff] %v462_v8  ;;  %v461_v10 = vmul.f32 0.6931472, %v605_v9 }
 0x4f2   :  { %v463_v11 = vsub.f32 %v449_v0, %v461_v10 }
 0x4f4   :  { %465 = vst [vmem:[#allocation8 + $0x8] sm:$0xff] %v463_v11 }
 0x4f5   :  { %683 = shalt.err (!%p680_p0)
}
 0x4f6   :  { %s684_s22 = scalar_lea.hbm %s907_s11, 256 }
 0x4f7   :  { %p685_p1 = scmp.ne.s32.totalorder %s907_s11, %s684_s22  ;;  %p688_p2 = scmp.lt.u32.totalorder %s684_s22, %s907_s11 }
 0x4f9   :  { %p690_p3 = pnand %p688_p2, %p685_p1 }
 0x4fb   :  { %693 = shalt.err (!%p690_p3)
}
 0x4fc   :  { %s708_s24 = smov 128   ;;  %s709_s25 = smov 8  }
 0x4fd   :  { %477 = dma.vmem_to_hbm [thread:$0]  %s472_s10, 256, %s907_s11, [#allocation4], %s708_s24, %s708_s24, %s709_s25  }
 0x4fe   :  { %698 = dma.done.wait [#allocation4], 256  }
 0x4ff   :  { %699 = vsyncadd [#allocation4], 4294967040 }
 0x500   :  { %481 = vsyncpa [#allocation3], 1 }
 0x501   :  { %482 = vsyncpa [#allocation6], 1 }
 0x502   :  { %483 = vsyncpa [#allocation4], 1 }

</bundles_post_ra>
